<compile_context>
chip_gen: v7x
topology: tpu7x:2x2x1
jax: 0.10.0
libtpu: 0.0.40
codegen_flags: <defaults>
</compile_context>

<pallas_src>
import functools
import math

import jax
import jax.numpy as jnp
from jax.experimental import pallas as pl
from jax.experimental.pallas import tpu as pltpu


def _round_up(x, m):
    return -(-x // m) * m


def _vmem_limit_bytes():
    """Generation-aware scoped-VMEM limit (v7x has 64 MiB/TC, v5e/v6e 128 MiB)."""
    try:
        cap = pltpu.get_tpu_info().vmem_capacity_bytes
    except Exception:
        cap = 64 * 1024 * 1024
    return max(32 * 1024 * 1024, min(int(cap * 0.75), 100 * 1024 * 1024))


def _tpu_kind():
    try:
        return jax.devices()[0].device_kind.lower()
    except Exception:
        return ""


# ----------------------------------------------------------------------------- conv
def _conv_mm_kernel(x_ref, w_ref, b_ref, o_ref, acc_ref, *, Gn, G, OW_pad, M_out):
    """One (batch n, row-tile t, H-phase ph, K-block kb) grid step.

    x_ref  : (1, 1, 1, M_halo, TK)  bf16 width-im2col tile (grouped rows)
    w_ref  : (1, Gn, TK, CO_pad)    bf16 packed weights for this (phase, K-block)
    b_ref  : (1, CO_pad)            f32 bias (zero-padded channels)
    o_ref  : (1, M_out, CO_pad)     bf16 output tile, written only on finalize
    acc_ref: (M_out, CO_pad)        f32 scratch accumulator, resident across (ph, kb)
    """
    ph = pl.program_id(2)
    kb = pl.program_id(3)

    @pl.when((ph == 0) & (kb == 0))
    def _init():
        acc_ref[...] = jnp.zeros(acc_ref.shape, jnp.float32)

    for g in range(Gn):                                          # static unroll (<=13)
        lhs = x_ref[0, 0, 0, pl.ds(g * G * OW_pad, M_out), :]    # static (M_out, TK)
        acc_ref[...] += jnp.dot(lhs, w_ref[0, g],
                                preferred_element_type=jnp.float32)

    @pl.when((ph == pl.num_programs(2) - 1) & (kb == pl.num_programs(3) - 1))
    def _finalize():
        o_ref[0] = jnp.maximum(acc_ref[...] + b_ref[...], 0.0).astype(o_ref.dtype)


def _choose_tiling(OH, OW_pad, Gn, G, KG, CO_pad, budget, min_T, even_T):
    """Pick (row-tiles T, TOH, K-tile TK, KB, padded K) so per-step blocks fit."""
    if KG <= 512:
        TK, KB = KG, 1
    else:
        TK, KB = 512, -(-KG // 512)
    Kp = TK * KB
    tkp = _round_up(TK, 128)          # lane padding of the K axis in VMEM
    halo = G * (Gn - 1)
    T = max(1, min_T) - 1
    while True:
        T += 1
        if even_T and T > 1 and (T % 2):
            continue                  # dual-TC chips: keep the parallel axis even
        TOH = -(-OH // T)
        lhs = (TOH + halo) * OW_pad * tkp * 2       # bf16 LHS block
        wgt = Gn * tkp * CO_pad * 2                 # bf16 RHS block
        outb = TOH * OW_pad * CO_pad * 2            # bf16 output block
        accb = TOH * OW_pad * CO_pad * 4            # f32 scratch accumulator
        tmpb = accb                                 # headroom for the dot result
        if 2 * (lhs + wgt + outb) + accb + tmpb <= budget or TOH <= 8:
            return T, TOH, TK, KB, Kp


@functools.partial(jax.jit, static_argnums=(3,))
def conv2d_relu_pallas(x_nhwc, w_oihw, b, stride):
    """PyTorch Conv2d(stride, padding=0) + bias + ReLU; NHWC in, bf16 NHWC out."""
    w = w_oihw.astype(jnp.float32)
    N, H, W, CI = x_nhwc.shape
    CO, CI_w, KH, KW = w.shape
    assert CI == CI_w
    s = int(stride)
    OH = (H - KH) // s + 1
    OW = (W - KW) // s + 1
    assert OH >= 1 and OW >= 1

    kind = _tpu_kind()
    is_v5e = ("v5 lite" in kind) or ("v5e" in kind) or ("v5litepod" in kind)
    is_dual = ("v7" in kind) or ("tpu7" in kind)    # 2 TensorCores per chip

    PH = s                        # phase-decompose kh along the stride
    Th = -(-KH // s)              # tap rows per phase (zero-padded taps beyond KH)
    K = KW * CI                   # width taps x input channels -> MXU contraction
    # Fold G=2 adjacent in-phase H-taps into K when K is shallow (fills the 256-deep
    # MXU on v6e/v7x); skip on v5e (128-deep MXU already full at K~100).
    G = 2 if (not is_v5e and Th >= 2 and 2 * K <= 256) else 1
    Gn = -(-Th // G)
    Th_pad = Gn * G
    KG = G * K
    CO_pad = _round_up(CO, 128)   # lane-dense stores + full MXU N dimension
    OW_pad = _round_up(OW, 8)

    vmem_limit = _vmem_limit_bytes()
    budget = int(vmem_limit * 0.8)
    min_T = 2 if (is_dual and OH >= 2) else 1
    T, TOH, TK, KB, Kp = _choose_tiling(OH, OW_pad, Gn, G, KG, CO_pad,
                                        budget, min_T, is_dual)
    OH_pad = T * TOH
    M_out = TOH * OW_pad
    halo = G * (Gn - 1)
    M_halo = (TOH + halo) * OW_pad

    # ---- glue: H-phase decomposition + width im2col (pure data movement, bf16) ----
    A = OH_pad + Th_pad - 1                  # phase rows needed (incl. halo)
    Ag = OH_pad + halo                       # grouped rows needed
    Hn = A * s                               # raw rows touched (phase-major)
    Wn = (OW_pad - 1) * s + KW               # raw cols touched
    xp = jnp.pad(x_nhwc, ((0, 0), (0, max(0, Hn - H)), (0, max(0, Wn - W)), (0, 0)))
    xp = xp[:, :Hn, :Wn, :].astype(jnp.bfloat16)
    # xp[n, a*s+ph, iw, ci] -> (PH, N, A, Wn, CI)
    xp = xp.reshape(N, A, s, Wn, CI).transpose(2, 0, 1, 3, 4)
    # width im2col with stride s: xi[ph,n,a,ow,kw*CI+ci] = x[n, a*s+ph, ow*s+kw, ci]
    cols = [xp[:, :, :, kw:kw + (OW_pad - 1) * s + 1:s, :] for kw in range(KW)]
    xi = jnp.stack(cols, axis=4).reshape(PH, N, A, OW_pad, K)
    # fold G adjacent taps into K: grouped row a = [im2col(row a) | im2col(row a+1)]
    if G > 1:
        xi = jnp.concatenate([xi[:, :, j:j + Ag] for j in range(G)], axis=-1)
    else:
        xi = xi[:, :, :Ag]
    if Kp > KG:
        xi = jnp.pad(xi, ((0, 0), (0, 0), (0, 0), (0, 0), (0, Kp - KG)))
    # pre-tile rows with the halo so kernel blocks never overlap (no copy if T == 1)
    if T == 1:
        xit = xi.reshape(PH, N, 1, M_halo, Kp)
    else:
        xit = jnp.stack([xi[:, :, t * TOH:t * TOH + TOH + halo] for t in range(T)],
                        axis=2).reshape(PH, N, T, M_halo, Kp)

    # weights: wp[ph, g, j*K + kw*CI + ci, co] = w[co, ci, (g*G+j)*s + ph, kw]
    wpad = jnp.pad(w, ((0, 0), (0, 0), (0, Th_pad * s - KH), (0, 0)))
    wp = wpad.reshape(CO, CI, Th_pad, s, KW).transpose(3, 2, 4, 1, 0)  # (PH,Thp,KW,CI,CO)
    wp = wp.reshape(PH, Gn, KG, CO)
    if Kp > KG:
        wp = jnp.pad(wp, ((0, 0), (0, 0), (0, Kp - KG), (0, 0)))
    if CO_pad > CO:
        wp = jnp.pad(wp, ((0, 0), (0, 0), (0, 0), (0, CO_pad - CO)))
    wp = wp.astype(jnp.bfloat16)
    b2 = jnp.pad(b.astype(jnp.float32).reshape(1, CO), ((0, 0), (0, CO_pad - CO)))

    grid = (N, T, PH, KB)
    out = pl.pallas_call(
        functools.partial(_conv_mm_kernel, Gn=Gn, G=G, OW_pad=OW_pad, M_out=M_out),
        out_shape=jax.ShapeDtypeStruct((N, OH_pad * OW_pad, CO_pad), jnp.bfloat16),
        grid_spec=pltpu.PrefetchScalarGridSpec(
            num_scalar_prefetch=0,
            grid=grid,
            in_specs=[
                pl.BlockSpec((1, 1, 1, M_halo, TK),
                             lambda n, t, ph, kb: (ph, n, t, 0, kb)),
                pl.BlockSpec((1, Gn, TK, CO_pad),
                             lambda n, t, ph, kb: (ph, 0, kb, 0)),
                pl.BlockSpec((1, CO_pad), lambda n, t, ph, kb: (0, 0)),
            ],
            out_specs=pl.BlockSpec((1, M_out, CO_pad),
                                   lambda n, t, ph, kb: (n, t, 0)),
            scratch_shapes=[pltpu.VMEM((M_out, CO_pad), jnp.float32)],
        ),
        compiler_params=pltpu.CompilerParams(
            dimension_semantics=("parallel", "parallel", "arbitrary", "arbitrary"),
            vmem_limit_bytes=vmem_limit,
        ),
    )(xit, wp, b2)

    out = out.reshape(N, OH_pad, OW_pad, CO_pad)[:, :OH, :OW, :CO]   # crop -> NHWC
    return out


# ---------------------------------------------------------------------------- model
class PallasNoPoolCNN:
    """Pallas port of NoPoolCNN: 3 x [Conv2d -> ReLU -> Dropout(identity)]."""

    def __init__(self, in_channels=1, key=None):
        if key is None:
            key = jax.random.PRNGKey(0)
        conv_specs = [(in_channels, 80, 100, 5), (80, 80, 50, 5), (80, 80, 25, 2)]
        self.params = []
        for i, (ci, co, kk, s) in enumerate(conv_specs):
            kw_key, kb_key = jax.random.split(jax.random.fold_in(key, i))
            bound = 1.0 / math.sqrt(ci * kk * kk)
            w = jax.random.uniform(kw_key, (co, ci, kk, kk), jnp.float32, -bound, bound)
            b = jax.random.uniform(kb_key, (co,), jnp.float32, -bound, bound)
            self.params.append((w, b, s))

    def __call__(self, x_nchw):
        x = jnp.transpose(x_nchw.astype(jnp.float32), (0, 2, 3, 1))  # NCHW -> NHWC
        for (w, b, s) in self.params:
            x = conv2d_relu_pallas(x, w, b, s)
            # Dropout(0.3): inference-mode identity.
        return jnp.transpose(x, (0, 3, 1, 2)).astype(jnp.float32)    # NHWC -> NCHW


# -------------------------------------------------------------------------- testing
def _reference_conv_relu(x_nchw, w, b, s):
    # bf16-round the operands (as the kernel does) and accumulate in f32.
    xb = x_nchw.astype(jnp.bfloat16).astype(jnp.float32)
    wb = w.astype(jnp.bfloat16).astype(jnp.float32)
    y = jax.lax.conv_general_dilated(
        xb, wb, window_strides=(s, s), padding="VALID",
        dimension_numbers=("NCHW", "OIHW", "NCHW"),
        precision=jax.lax.Precision.HIGHEST)
    return jnp.maximum(y + b[None, :, None, None], 0.0)


if __name__ == "__main__":
    # Small-shape correctness checks of the conv+ReLU Pallas kernel against XLA
    # (covers CI>1, stride>1, tap grouping, and the zero-padded-tap case KH % s != 0).
    for (n_b, ci, co, hw, kk, st) in [(2, 3, 16, 21, 6, 2), (2, 4, 8, 17, 5, 3)]:
        key = jax.random.fold_in(jax.random.PRNGKey(0), kk)
        kx, kw_, kb_ = jax.random.split(key, 3)
        xs = jax.random.normal(kx, (n_b, ci, hw, hw), jnp.float32)
        ws = jax.random.uniform(kw_, (co, ci, kk, kk), jnp.float32, -0.2, 0.2)
        bs = jax.random.uniform(kb_, (co,), jnp.float32, -0.2, 0.2)
        got = conv2d_relu_pallas(jnp.transpose(xs, (0, 2, 3, 1)), ws, bs, st)
        got = jnp.transpose(got, (0, 3, 1, 2)).astype(jnp.float32)
        ref = _reference_conv_relu(xs, ws, bs, st)
        assert got.shape == ref.shape, (got.shape, ref.shape)
        assert jnp.allclose(got, ref, atol=3e-2, rtol=3e-2), \
            float(jnp.max(jnp.abs(got - ref)))

    # Full NoPoolCNN forward.  Kernels 100/50/25 with strides 5/5/2 make 945x945 the
    # smallest legal spatial input (conv outputs 170 -> 25 -> 1); batch=1 and
    # in_channels=1 per the module's default input_shape=(1,).
    model = PallasNoPoolCNN(in_channels=1)
    x = jax.random.normal(jax.random.PRNGKey(0), (1, 1, 945, 945), jnp.float32)
    out = jax.block_until_ready(model(x))
    assert out.shape == (1, 80, 1, 1), out.shape
    assert bool(jnp.all(jnp.isfinite(out)))
    print("KERNEL_OK")
</pallas_src>

<mosaic_0001>
module attributes {stable_mosaic.version = 11 : i64} {
  func.func @_conv_mm_kernel(%arg0: i32, %arg1: i32, %arg2: i32, %arg3: i32, %arg4: memref<1x1x1x80x36xbf16, #tpu.memory_space<vmem>>, %arg5: memref<1x2x36x128xbf16, #tpu.memory_space<vmem>>, %arg6: memref<1x128xf32, #tpu.memory_space<vmem>>, %arg7: memref<1x64x128xbf16, #tpu.memory_space<vmem>>, %arg8: memref<64x128xf32, #tpu.memory_space<vmem>>) attributes {dimension_semantics = [#tpu.dimension_semantics<parallel>, #tpu.dimension_semantics<parallel>, #tpu.dimension_semantics<arbitrary>, #tpu.dimension_semantics<arbitrary>], iteration_bounds = array<i64: 2, 1, 2, 1>, scalar_prefetch = 0 : i64, scratch_operands = 1 : i64, tpu.core_type = #tpu.core_type<tc>, window_params = [{transform_indices = @transform_0, window_bounds = array<i64: 1, 1, 1, 80, 36>}, {transform_indices = @transform_1, window_bounds = array<i64: 1, 2, 36, 128>}, {pipeline_mode = #tpu.pipeline_mode<synchronous>, transform_indices = @transform_2, window_bounds = array<i64: 1, 128>}, {transform_indices = @transform_3, window_bounds = array<i64: 1, 64, 128>}]} {
    %c0_i32 = arith.constant 0 : i32
    %0 = arith.cmpi eq, %arg2, %c0_i32 : i32
    %c0_i32_0 = arith.constant 0 : i32
    %1 = arith.cmpi eq, %arg3, %c0_i32_0 : i32
    %2 = arith.andi %0, %1 : i1
    %3 = arith.extui %2 : i1 to i32
    %c0_i32_1 = arith.constant 0 : i32
    %4 = arith.cmpi ne, %3, %c0_i32_1 : i32
    scf.if %4 {
      %cst_28 = arith.constant 0.000000e+00 : f32
      %26 = vector.broadcast %cst_28 : f32 to vector<64x128xf32>
      %c0_29 = arith.constant 0 : index
      %c0_30 = arith.constant 0 : index
      %27 = vector.load %arg8[%c0_29, %c0_30] : memref<64x128xf32, #tpu.memory_space<vmem>>, vector<64x128xf32>
      tpu.vector_store %arg8[%c0_29, %c0_30], %26 {strides = array<i32>} : memref<64x128xf32, #tpu.memory_space<vmem>>, vector<64x128xf32>,
    } else {
    }
    %c0 = arith.constant 0 : index
    %c0_2 = arith.constant 0 : index
    %c0_3 = arith.constant 0 : index
    %c0_4 = arith.constant 0 : index
    %c0_5 = arith.constant 0 : index
    %5 = vector.load %arg4[%c0, %c0_2, %c0_3, %c0_4, %c0_5] : memref<1x1x1x80x36xbf16, #tpu.memory_space<vmem>>, vector<1x1x1x64x36xbf16>
    %6 = vector.shape_cast %5 : vector<1x1x1x64x36xbf16> to vector<64x36xbf16>
    %c0_6 = arith.constant 0 : index
    %c0_7 = arith.constant 0 : index
    %7 = vector.load %arg8[%c0_6, %c0_7] : memref<64x128xf32, #tpu.memory_space<vmem>>, vector<64x128xf32>
    %c0_8 = arith.constant 0 : index
    %c0_9 = arith.constant 0 : index
    %c0_10 = arith.constant 0 : index
    %c0_11 = arith.constant 0 : index
    %8 = vector.load %arg5[%c0_8, %c0_9, %c0_10, %c0_11] : memref<1x2x36x128xbf16, #tpu.memory_space<vmem>>, vector<1x1x36x128xbf16>
    %9 = vector.shape_cast %8 : vector<1x1x36x128xbf16> to vector<36x128xbf16>
    %cst = arith.constant dense<0.000000e+00> : vector<64x128xf32>
    %10 = tpu.matmul %6, %9, %cst {dimension_numbers = #tpu.dot_dimension_numbers<[1], [0], [0], [1], [0, 0, 1, 1], [], []>} : vector<64x36xbf16>, vector<36x128xbf16>, vector<64x128xf32> -> vector<64x128xf32>
    %11 = arith.addf %7, %10 : vector<64x128xf32>
    %c0_12 = arith.constant 0 : index
    %c0_13 = arith.constant 0 : index
    %12 = vector.load %arg8[%c0_12, %c0_13] : memref<64x128xf32, #tpu.memory_space<vmem>>, vector<64x128xf32>
    tpu.vector_store %arg8[%c0_12, %c0_13], %11 {strides = array<i32>} : memref<64x128xf32, #tpu.memory_space<vmem>>, vector<64x128xf32>,
    %c0_14 = arith.constant 0 : index
    %c0_15 = arith.constant 0 : index
    %c0_16 = arith.constant 0 : index
    %c16 = arith.constant 16 : index
    %c0_17 = arith.constant 0 : index
    %13 = vector.load %arg4[%c0_14, %c0_15, %c0_16, %c16, %c0_17] : memref<1x1x1x80x36xbf16, #tpu.memory_space<vmem>>, vector<1x1x1x64x36xbf16>
    %14 = vector.shape_cast %13 : vector<1x1x1x64x36xbf16> to vector<64x36xbf16>
    %c0_18 = arith.constant 0 : index
    %c0_19 = arith.constant 0 : index
    %15 = vector.load %arg8[%c0_18, %c0_19] : memref<64x128xf32, #tpu.memory_space<vmem>>, vector<64x128xf32>
    %c0_20 = arith.constant 0 : index
    %c1 = arith.constant 1 : index
    %c0_21 = arith.constant 0 : index
    %c0_22 = arith.constant 0 : index
    %16 = vector.load %arg5[%c0_20, %c1, %c0_21, %c0_22] : memref<1x2x36x128xbf16, #tpu.memory_space<vmem>>, vector<1x1x36x128xbf16>
    %17 = vector.shape_cast %16 : vector<1x1x36x128xbf16> to vector<36x128xbf16>
    %cst_23 = arith.constant dense<0.000000e+00> : vector<64x128xf32>
    %18 = tpu.matmul %14, %17, %cst_23 {dimension_numbers = #tpu.dot_dimension_numbers<[1], [0], [0], [1], [0, 0, 1, 1], [], []>} : vector<64x36xbf16>, vector<36x128xbf16>, vector<64x128xf32> -> vector<64x128xf32>
    %19 = arith.addf %15, %18 : vector<64x128xf32>
    %c0_24 = arith.constant 0 : index
    %c0_25 = arith.constant 0 : index
    %20 = vector.load %arg8[%c0_24, %c0_25] : memref<64x128xf32, #tpu.memory_space<vmem>>, vector<64x128xf32>
    tpu.vector_store %arg8[%c0_24, %c0_25], %19 {strides = array<i32>} : memref<64x128xf32, #tpu.memory_space<vmem>>, vector<64x128xf32>,
    %c1_i32 = arith.constant 1 : i32
    %21 = arith.cmpi eq, %arg2, %c1_i32 : i32
    %c0_i32_26 = arith.constant 0 : i32
    %22 = arith.cmpi eq, %arg3, %c0_i32_26 : i32
    %23 = arith.andi %21, %22 : i1
    %24 = arith.extui %23 : i1 to i32
    %c0_i32_27 = arith.constant 0 : i32
    %25 = arith.cmpi ne, %24, %c0_i32_27 : i32
    scf.if %25 {
      %c0_28 = arith.constant 0 : index
      %c0_29 = arith.constant 0 : index
      %26 = vector.load %arg8[%c0_28, %c0_29] : memref<64x128xf32, #tpu.memory_space<vmem>>, vector<64x128xf32>
      %c0_30 = arith.constant 0 : index
      %c0_31 = arith.constant 0 : index
      %27 = vector.load %arg6[%c0_30, %c0_31] : memref<1x128xf32, #tpu.memory_space<vmem>>, vector<1x128xf32>
      %28 = vector.broadcast %27 : vector<1x128xf32> to vector<64x128xf32>
      %29 = arith.addf %26, %28 : vector<64x128xf32>
      %cst_32 = arith.constant 0.000000e+00 : f32
      %30 = vector.broadcast %cst_32 : f32 to vector<64x128xf32>
      %31 = arith.maximumf %29, %30 : vector<64x128xf32>
      %32 = arith.truncf %31 : vector<64x128xf32> to vector<64x128xbf16>
      %c0_33 = arith.constant 0 : index
      %c0_34 = arith.constant 0 : index
      %c0_35 = arith.constant 0 : index
      %33 = vector.load %arg7[%c0_33, %c0_34, %c0_35] : memref<1x64x128xbf16, #tpu.memory_space<vmem>>, vector<1x64x128xbf16>
      %34 = vector.shape_cast %33 : vector<1x64x128xbf16> to vector<64x128xbf16>
      %35 = vector.shape_cast %32 : vector<64x128xbf16> to vector<1x64x128xbf16>
      tpu.vector_store %arg7[%c0_33, %c0_34, %c0_35], %35 {strides = array<i32>} : memref<1x64x128xbf16, #tpu.memory_space<vmem>>, vector<1x64x128xbf16>,
    } else {
    }
    return
  }
  func.func @transform_0(%arg0: i32, %arg1: i32, %arg2: i32, %arg3: i32) -> (i32, i32, i32, i32, i32) {
    %c0_i32 = arith.constant 0 : i32
    %c0_i32_0 = arith.constant 0 : i32
    return %arg2, %arg0, %arg1, %c0_i32, %arg3 : i32, i32, i32, i32, i32
  }
  func.func @transform_1(%arg0: i32, %arg1: i32, %arg2: i32, %arg3: i32) -> (i32, i32, i32, i32) {
    %c0_i32 = arith.constant 0 : i32
    %c0_i32_0 = arith.constant 0 : i32
    %c0_i32_1 = arith.constant 0 : i32
    return %arg2, %c0_i32, %arg3, %c0_i32_0 : i32, i32, i32, i32
  }
  func.func @transform_2(%arg0: i32, %arg1: i32, %arg2: i32, %arg3: i32) -> (i32, i32) {
    %c0_i32 = arith.constant 0 : i32
    %c0_i32_0 = arith.constant 0 : i32
    %c0_i32_1 = arith.constant 0 : i32
    return %c0_i32, %c0_i32_0 : i32, i32
  }
  func.func @transform_3(%arg0: i32, %arg1: i32, %arg2: i32, %arg3: i32) -> (i32, i32, i32) {
    %c0_i32 = arith.constant 0 : i32
    %c0_i32_0 = arith.constant 0 : i32
    return %arg0, %arg1, %c0_i32 : i32, i32, i32
  }
}

</mosaic_0001>

<bundles_post_ra>
// kernel: conv2d_relu_pallas.1
= control target key start
LH: loop header
LB: loop body
LE: loop exit
PB: predicated region body
PF: predicated region fallthrough
CT: control target
= control target key end

     0   :  { %8 = vsyncpa [#allocation4], 0  ;;  %s1365_s0 = inlined_call_operand.vmem [shape: bf16[2,2,1,80,36], index: 0, kind: input, shape index: {}]   ;;  %s1366_s1 = inlined_call_operand.vmem [shape: bf16[2,2,36,128], index: 1, kind: input, shape index: {}]   ;;  %s1367_s2 = inlined_call_operand.vmem [shape: f32[1,128], index: 2, kind: input, shape index: {}]   ;;  %s1368_s3 = inlined_call_operand.hbm [shape: bf16[2,64,128], index: 3, kind: output, shape index: {}]  }
   0x1   :  { %10 = vsyncpa [#allocation4 + $0x1], 0  ;;  %s1177_s12 = smov 0   ;;  %s1179_s13 = smov 0  }
   0x2   :  { %s1181_s14 = smov 0   ;;  %s1183_s15 = smov 0  }
   0x3   :  { %s1185_s16 = smov 0   ;;  %s1187_s17 = smov 0  }
   0x4   :  { %s1189_s18 = smov 0   ;;  %s1191_s19 = smov 0  }
   0x5 LB: > { %s805_s20 = sadd.s32 4294967295, %s1151_s19   ;;  %s806_s21 = sadd.s32 4294967294, %s1151_s19   ;;  %s1151_s19 = sphi %s1191_s19, %s16_s19   ;;  %s1147_s18 = sphi %s1189_s18, %s1382_s18   ;;  %s1143_s17 = sphi %s1187_s17, %s1381_s17   ;;  %s1139_s16 = sphi %s1185_s16, %s1380_s16   ;;  %s1135_s15 = sphi %s1183_s15, %s1379_s15   ;;  %s1131_s14 = sphi %s1181_s14, %s1378_s14   ;;  %s1127_s13 = sphi %s1179_s13, %s1377_s13   ;;  %s1123_s12 = sphi %s1177_s12, %s1376_s12  }
   0x6   : > { %s34_s22 = sadd.s32 1, %s1143_s17  ;;  %s42_s23 = sadd.s32 1, %s1147_s18 }
   0x7   : > { %p36_p0 = scmp.ge.s32.totalorder %s34_s22, 2  ;;  %p142_p1 = scmp.ne.s32.totalorder %s1131_s14, %s1127_s13 }
   0x8   : > { %p143_p2 = scmp.eq.s32.totalorder %s805_s20, 3  ;;  %p148_p4 = scmp.ne.s32.totalorder %s1127_s13, %s1123_s12 }
   0x9   : > { %s1384_s22 = smov (%p36_p0, %s34_s22), 0  ;;  %s1386_s23 = smov (!%p36_p0, %s42_s23), %s1147_s18 }
   0xa   : > { %p1226_p3 = por %p143_p2, %p142_p1  ;;  %p44_p5 = scmp.ge.s32.totalorder %s1386_s23, 2 }
   0xb   : > { %p149_p6 = scmp.eq.s32.totalorder %s806_s21, 3  ;;  %p809_p7 = scmp.ge.s32.totalorder %s1151_s19, 1 }
   0xc   : > { %p202_p8 = scmp.lt.s32.totalorder %s1151_s19, 5  ;;  %s1388_s23 = smov (%p44_p5, %s1386_s23), 0 }
   0xd   : > { %1372 = sst [smem:[#allocation6_spill]] %s1388_s23  ;;  %p1236_p9 = por %p149_p6, %p148_p4 }
   0xe   : > { %p203_p10 = pnand %p809_p7, %p202_p8  ;;  %s127_s26 = ssub.s32 %s1147_s18, %s1388_s23 }
   0xf   : > { %s132_s27 = sadd.s32 1, %s1131_s14  ;;  %p130_p11 = scmp.eq.s32.totalorder %s127_s26, 0 }
  0x10   : > { %206 = sbr.rel (%p203_p10) target bundleno = 316 (0x13c), region = 32  ;;  %s1370_s29 = sand.u32 (!%p203_p10), 1, %s1127_s13  }
  0x11   : > { %s1244_s28 = scalar_select %p130_p11, %s1131_s14, %s132_s27  }
  0x12   : > { %p246_p12 = scmp.lt.s32.totalorder (!%p203_p10), %s1135_s15, 1  ;;  %s810_s30 = sshll.u32 (!%p203_p10), %s1370_s29, 5 }
  0x13   : > { %p248_p13 = scmp.lt.s32.totalorder (!%p203_p10), %s1139_s16, 1  ;;  %p274_p0 = scmp.eq.s32.totalorder (!%p203_p10), %s1135_s15, 0 }
  0x14   : > { %s1264_s29 = scalar_lea.vmem (!%p203_p10), [#allocation3], %s810_s30 }
  0x17   : > { %s247_s4 = scalar_select %p246_p12, %s1135_s15, 1 }
  0x18   : > { %s249_s5 = scalar_select %p248_p13, %s1139_s16, 1 }
  0x19   : > { %s967_s6 = smul.u32 20, %s247_s4  ;;  %v1153_v0 = vmov (%p274_p0), 0.0  }
  0x1a   : > { %s966_s7 = smul.u32 10, %s249_s5  ;;  %280 = vst [vmem:[#allocation2] sm:$0xff] (%p274_p0), %v1153_v0  ;;  %281 = vst [vmem:[#allocation2 + $0x8] sm:$0xff] (%p274_p0), %v1153_v0 }
  0x1b   : > { %s968_s8 = smul.u32 40, %s247_s4  ;;  %282 = vst [vmem:[#allocation2 + $0x10] sm:$0xff] (%p274_p0), %v1153_v0  ;;  %283 = vst [vmem:[#allocation2 + $0x18] sm:$0xff] (%p274_p0), %v1153_v0 }
  0x1c   : > { %s259_s9 = sadd.s32 %s967_s6, %s966_s7  ;;  %279 = sbr.rel (!%p274_p0) target bundleno = 35 (0x23), region = 36  ;;  %284 = vst [vmem:[#allocation2 + $0x20] sm:$0xff] (%p274_p0), %v1153_v0  ;;  %285 = vst [vmem:[#allocation2 + $0x28] sm:$0xff] (%p274_p0), %v1153_v0 }
  0x1d   : > { %s811_s10 = sshll.u32 %s259_s9, 2  ;;  %s1257_s21 = scalar_lea.vmem %s1366_s1, %s968_s8  ;;  %286 = vst [vmem:[#allocation2 + $0x30] sm:$0xff] (%p274_p0), %v1153_v0  ;;  %287 = vst [vmem:[#allocation2 + $0x38] sm:$0xff] (%p274_p0), %v1153_v0 }
  0x1e   : > { %s1262_s23 = scalar_lea.vmem %s1365_s0, %s811_s10 }
  0x23 PF: > { %v1043_v1 = vld [vmem:[%s1257_s21] sm:$0xff]   ;;  %v1044_v2 = vld [vmem:[%s1257_s21 + $0x8] sm:$0xff]   ;;  %vm357_vm0 = vcmask 1041408   ;;  %v1045_v3 = vld [vmem:[%s1257_s21 + $0x14] sm:$0xff]   ;;  %vm344_vm1 = vcmask 293888   ;;  %p595_p1 = scmp.eq.s32.totalorder %s1135_s15, 1 }
  0x24   : > { %904 = vmatprep.subr.bf16.mxu1 %v1043_v1  ;;  %v1046_v4 = vld [vmem:[%s1257_s21 + $0x10] ss:$0 sps:$4 sm:$0x33]   ;;  %v1047_v5 = vld [vmem:[%s1262_s23] sm:$0xff]   ;;  %918 = vmatprep.subr.bf16.mxu0 %v1045_v3  ;;  %v1051_v9 = vld [vmem:[%s1262_s23 + $0x8] sm:$0xff]  }
  0x25   : > { %905 = vmatpush3.bf16.msra.mxu1 %v1043_v1  ;;  %919 = vmatpush3.bf16.msra.mxu0 %v1045_v3  ;;  %v1048_v6 = vld [vmem:[%s1257_s21 + $0x1c] sm:$0xff]   ;;  %v359_v7 = vsel %vm357_vm0, %v1046_v4, 0  ;;  %v1050_v8 = vld [vmem:[%s1257_s21 + $0x24] ss:$0 sps:$4 sm:$0x33]   ;;  %v1049_v10 = vld [vmem:[%s1262_s23 + $0x8] sm:$0xff]  }
  0x26   : > { %906 = vmatprep.subr.bf16.mxu1 %v1044_v2  ;;  %910 = vmatprep.mubr.msk.bf16.mxu1 %vm344_vm1, %v1047_v5  ;;  %v512_v11 = vsel %vm357_vm0, %v1050_v8, 0  ;;  %v1052_v12 = vld [vmem:[%s1262_s23 + $0x10] sm:$0xff]   ;;  %v1055_v14 = vld [vmem:[%s1262_s23 + $0x18] sm:$0xff]   ;;  %v1056_v16 = vld [vmem:[%s1262_s23 + $0x20] sm:$0xff]  }
  0x27   : > { %920 = vmatprep.subr.bf16.mxu0 %v1048_v6  ;;  %924 = vmatprep.mubr.msk.bf16.mxu0 %vm344_vm1, %v1051_v9  ;;  %v1053_v13 = vld [vmem:[%s1262_s23 + $0x10] sm:$0xff]   ;;  %v1054_v15 = vld [vmem:[%s1262_s23 + $0x18] sm:$0xff]   ;;  %v296_v18 = vld [vmem:[#allocation2] sm:$0xff] }
  0x28   : > { %v298_v17 = vld [vmem:[#allocation2 + $0x10] sm:$0xff]  ;;  %v299_v20 = vld [vmem:[#allocation2 + $0x18] sm:$0xff]  ;;  %v297_v23 = vld [vmem:[#allocation2 + $0x8] sm:$0xff] }
  0x29   : > { %907 = vmatpush3.bf16.msra.mxu1 %v1044_v2  ;;  %921 = vmatpush3.bf16.msra.mxu0 %v1048_v6  ;;  %v302_v36 = vld [vmem:[#allocation2 + $0x30] sm:$0xff]  ;;  %v300_v38 = vld [vmem:[#allocation2 + $0x20] sm:$0xff]  ;;  %v303_v40 = vld [vmem:[#allocation2 + $0x38] sm:$0xff] }
  0x2a   : > { %964 = vmatprep.subr.msk.bf16.mxu1 %vm357_vm0, %v1046_v4  ;;  %965 = vmatprep.subr.msk.bf16.mxu0 %vm357_vm0, %v1050_v8  ;;  %v301_v43 = vld [vmem:[#allocation2 + $0x28] sm:$0xff]  ;;  %v842_v59 = vld [vmem:[%s1367_s2] ss:$0 sm:$0xff] (%p595_p1) }
  0x2d   : > { %909 = vmatpush3.bf16.msra.mxu1 %v359_v7  ;;  %923 = vmatpush3.bf16.msra.mxu0 %v512_v11 }
  0x30   : > { %911 = vmatmul.mubr.msk.bf16.vlgmr.msra.gmra.mrb[0].mxu1 %vm344_vm1, %v1049_v10  ;;  %925 = vmatmul.mubr.msk.bf16.vlgmr.msra.gmra.mrb[0].mxu0 %vm344_vm1, %v1053_v13 }
  0x31   : > { %914 = vmatprep.mubr.msk.bf16.mxu1 %vm344_vm1, %v1052_v12  ;;  %928 = vmatprep.mubr.msk.bf16.mxu0 %vm344_vm1, %v1055_v14 }
  0x38   : > { %915 = vmatmul.mubr.msk.bf16.gmra.mrb[4].mxu1 %vm344_vm1, %v1054_v15  ;;  %929 = vmatmul.mubr.msk.bf16.gmra.mrb[4].mxu0 %vm344_vm1, %v1056_v16 }
 0x103   : > { %v912_v19 = vpop.f32.mrb[0].mxu1  ;;  %v926_v26 = vpop.f32.mrb[0].mxu0 }
 0x104   : > { %v428_v21 = vadd.f32 %v912_v19, %v298_v17  ;;  %v395_v22 = vpop.f32.mrb[1].mxu1  ;;  %v548_v30 = vpop.f32.mrb[1].mxu0 }
 0x105   : > { %v426_v24 = vadd.f32 %v395_v22, %v296_v18  ;;  %v913_v25 = vpop.f32.mrb[2].mxu1  ;;  %v927_v33 = vpop.f32.mrb[2].mxu0 }
 0x106   : > { %v429_v27 = vadd.f32 %v913_v25, %v299_v20  ;;  %v398_v28 = vpop.f32.mrb[3].mxu1  ;;  %v935_v29 = vadd.f32 %v926_v26, %v428_v21  ;;  %v551_v35 = vpop.f32.mrb[3].mxu0 }
 0x107   : > { %v427_v31 = vadd.f32 %v398_v28, %v297_v23  ;;  %v939_v32 = vadd.f32 %v548_v30, %v426_v24 }
 0x108   : > { %589 = vst [vmem:[#allocation2 + $0x10] sm:$0xff] %v935_v29  ;;  %v943_v34 = vadd.f32 %v927_v33, %v429_v27 }
 0x109   : > { %587 = vst [vmem:[#allocation2] sm:$0xff] %v939_v32  ;;  %v947_v37 = vadd.f32 %v551_v35, %v427_v31 }
 0x10a   : > { %590 = vst [vmem:[#allocation2 + $0x18] sm:$0xff] %v943_v34 }
 0x10b   : > { %v916_v39 = vpop.f32.mrb[4].mxu1  ;;  %588 = vst [vmem:[#allocation2 + $0x8] sm:$0xff] %v947_v37  ;;  %v930_v46 = vpop.f32.mrb[4].mxu0 }
 0x10c   : > { %v432_v41 = vadd.f32 %v916_v39, %v302_v36  ;;  %v411_v42 = vpop.f32.mrb[5].mxu1  ;;  %v564_v50 = vpop.f32.mrb[5].mxu0 }
 0x10d   : > { %v430_v44 = vadd.f32 %v411_v42, %v300_v38  ;;  %v917_v45 = vpop.f32.mrb[6].mxu1  ;;  %v931_v53 = vpop.f32.mrb[6].mxu0  ;;  %599 = sbr.rel (!%p595_p1) target bundleno = 290 (0x122), region = 40 }
 0x10e   : > { %v433_v47 = vadd.f32 %v917_v45, %v303_v40  ;;  %v414_v48 = vpop.f32.mrb[7].mxu1  ;;  %v951_v49 = vadd.f32 %v930_v46, %v432_v41  ;;  %v567_v55 = vpop.f32.mrb[7].mxu0 }
 0x10f   : > { %v431_v51 = vadd.f32 %v414_v48, %v301_v43  ;;  %v955_v52 = vadd.f32 %v564_v50, %v430_v44  ;;  %v602_v62 = vld [vmem:[#allocation2 + $0x10] sm:$0xff] (%p595_p1) }
 0x110   : > { %593 = vst [vmem:[#allocation2 + $0x30] sm:$0xff] %v951_v49  ;;  %v959_v54 = vadd.f32 %v931_v53, %v433_v47  ;;  %v600_v57 = vld [vmem:[#allocation2] sm:$0xff] (%p595_p1)  ;;  %v617_v1 = vadd.f32 (%p595_p1), %v842_v59, %v602_v62 }
 0x111   : > { %591 = vst [vmem:[#allocation2 + $0x20] sm:$0xff] %v955_v52  ;;  %v963_v56 = vadd.f32 %v567_v55, %v431_v51  ;;  %v615_v60 = vadd.f32 (%p595_p1), %v842_v59, %v600_v57  ;;  %v603_v63 = vld [vmem:[#allocation2 + $0x18] sm:$0xff] (%p595_p1) }
 0x112   : > { %594 = vst [vmem:[#allocation2 + $0x38] sm:$0xff] %v959_v54  ;;  %v601_v58 = vld [vmem:[#allocation2 + $0x8] sm:$0xff] (%p595_p1)  ;;  %v618_v2 = vadd.f32 (%p595_p1), %v842_v59, %v603_v63  ;;  %v625_v11 = vmax.f32 (%p595_p1), %v617_v1, 0.0 }
 0x113   : > { %592 = vst [vmem:[#allocation2 + $0x28] sm:$0xff] %v963_v56  ;;  %v616_v61 = vadd.f32 (%p595_p1), %v842_v59, %v601_v58  ;;  %v623_v7 = vmax.f32 (%p595_p1), %v615_v60, 0.0 }
 0x114   : > { %v626_v12 = vmax.f32 %v618_v2, 0.0 }
 0x115   : > { %v624_v8 = vmax.f32 %v616_v61, 0.0 }
 0x116   : > { %v875_v18 = vpack.c.bf16 %v626_v12, %v625_v11 }
 0x117   : > { %v606_v5 = vld [vmem:[#allocation2 + $0x30] sm:$0xff]  ;;  %v870_v15 = vpack.c.bf16 %v624_v8, %v623_v7 }
 0x118   : > { %v604_v0 = vld [vmem:[#allocation2 + $0x20] sm:$0xff]  ;;  %v621_v10 = vadd.f32 %v842_v59, %v606_v5  ;;  %887 = vst [vmem:[%s1264_s29 + $0x8] sm:$0xff] %v875_v18  }
 0x119   : > { %v619_v4 = vadd.f32 %v842_v59, %v604_v0  ;;  %v607_v6 = vld [vmem:[#allocation2 + $0x38] sm:$0xff]  ;;  %871 = vst [vmem:[%s1264_s29] sm:$0xff] %v870_v15  }
 0x11a   : > { %v605_v3 = vld [vmem:[#allocation2 + $0x28] sm:$0xff]  ;;  %v622_v14 = vadd.f32 %v842_v59, %v607_v6  ;;  %v629_v17 = vmax.f32 %v621_v10, 0.0 }
 0x11b   : > { %v620_v9 = vadd.f32 %v842_v59, %v605_v3  ;;  %v627_v13 = vmax.f32 %v619_v4, 0.0 }
 0x11c   : > { %v630_v19 = vmax.f32 %v622_v14, 0.0 }
 0x11d   : > { %v628_v16 = vmax.f32 %v620_v9, 0.0 }
 0x11e   : > { %v885_v21 = vpack.c.bf16 %v630_v19, %v629_v17 }
 0x11f   : > { %v880_v20 = vpack.c.bf16 %v628_v16, %v627_v13 }
 0x120   : > { %889 = vst [vmem:[%s1264_s29 + $0x18] sm:$0xff] %v885_v21  }
 0x121   : > { %888 = vst [vmem:[%s1264_s29 + $0x10] sm:$0xff] %v880_v20  }
 0x122 PF: > { %s866_s15 = sshll.u32 %s1139_s16, 9  ;;  %s687_s7 = sshll.u32 %s1264_s29, 4  ;;  %s1309_s7 = int_to_ptr.vmem [resolvable:$true] %s687_s7 }
 0x123   : > { %s1306_s6 = scalar_lea.hbm %s1368_s3, %s866_s15  ;;  %s1374_s8 = sand.u32 1, %s1127_s13  }
 0x124   : > { %s1313_s9 = scalar_lea.sflag [#allocation4], %s1374_s8  ;;  %s1057_s10 = scalar_lea.vmem %s1309_s7, 512 }
 0x125   : > { %p1058_p2 = scmp.ne.s32.totalorder %s1309_s7, %s1057_s10  ;;  %s1154_s16 = smov [#allocation3]  }
 0x126   : > { %s1061_s11 = sshll.u32 %s1154_s16, 4  ;;  %s1062_s11 = int_to_ptr.vmem [resolvable:$false] %s1061_s11 }
 0x127   : > { %p1059_p4 = pnand %p1058_p2, %p1226_p3  ;;  %s1063_s20 = scalar_lea.vmem %s1062_s11, 1024 }
 0x128   : > { %p1064_p6 = scmp.lt.s32.totalorder %s1309_s7, %s1062_s11  ;;  %p1065_p7 = scmp.lt.s32.totalorder %s1063_s20, %s1057_s10 }
 0x129   : > { %p1060_p5 = pneg %p1059_p4 }
 0x12a   : > { %p1066_p8 = por %p1065_p7, %p1064_p6 }
 0x12c   : > { %p1067_p10 = pnand %p1066_p8, %p1060_p5 }
 0x12e   : > { %1070 = shalt.err (!%p1067_p10)
}
 0x12f   : > { %s1071_s29 = scalar_lea.hbm %s1306_s6, 512  ;;  %s1075_s27 = scalar_lea.hbm %s1368_s3, 1024 }
 0x130   : > { %p1072_p11 = scmp.ne.s32.totalorder %s1306_s6, %s1071_s29  ;;  %p1076_p0 = scmp.lt.u32.totalorder %s1306_s6, %s1368_s3 }
 0x131   : > { %p1077_p1 = scmp.lt.u32.totalorder %s1075_s27, %s1071_s29  ;;  %p1079_p4 = scmp.lt.u32.totalorder %s1071_s29, %s1306_s6 }
 0x132   : > { %p1073_p12 = pnand %p1072_p11, %p1226_p3 }
 0x133   : > { %p1078_p2 = por %p1077_p1, %p1076_p0 }
 0x134   : > { %p1074_p13 = pneg %p1073_p12 }
 0x135   : > { %p1080_p5 = por %p1079_p4, %p1078_p2 }
 0x137   : > { %p1081_p6 = pnand %p1080_p5, %p1074_p13 }
 0x139   : > { %1084 = shalt.err (!%p1081_p6)
}
 0x13a   : > { %s1155_s15 = smov 64   ;;  %s1156_s4 = smov 4  }
 0x13b   : > { %969 = dma.vmem_to_hbm [thread:$0]  (%p1226_p3), %s1309_s7, 512, %s1306_s6, %s1313_s9, %s1155_s15, %s1155_s15, %s1156_s4  }
 0x13c PF: > { %p975_p7 = scmp.ge.s32.totalorder %s1151_s19, 2  ;;  %s702_s5 = sand.u32 1, %s1123_s12  }
 0x13d   : > { %s703_s8 = scalar_lea.sflag [#allocation4], %s702_s5 }
 0x13e   : > { %p972_p8 = pnand %p975_p7, %p1236_p9 }
 0x140   : > { %1118 = dma.done.wait (!%p972_p8), %s703_s8, 512  }
 0x141   : > { %1120 = vsyncadd (!%p972_p8), %s703_s8, 4294966784  ;;  %s16_s19 = sadd.s32 1, %s1151_s19   ;;  %s1375_s24 = sld [smem:[#allocation6_spill]] }
 0x142   : > { %p13_p10 = scmp.ge.s32.totalorder %s16_s19, 6   ;;  %s1376_s12 = smov %s1127_s13 }
 0x143   : > { %s1377_s13 = smov %s1131_s14  ;;  %s1378_s14 = smov %s1244_s28 }
 0x144   : > { %s1379_s15 = smov %s1143_s17  ;;  %s1380_s16 = smov %s1147_s18 }
 0x145   : > { %s1381_s17 = smov %s1384_s22  ;;  %15 = sbr.rel (!%p13_p10) target bundleno = 5 (0x5), region = 79 }
 0x147   : > { %s1382_s18 = smov %s1375_s24 }
 0x14c   :  { %708 = vsyncpa [#allocation4], 1 }
 0x14d   :  { %710 = vsyncpa [#allocation4 + $0x1], 1 }

</bundles_post_ra>
